<compile_context>
chip_gen: v5e
topology: v5e:2x2
jax: 0.10.0
libtpu: 0.0.40
codegen_flags: <defaults>
</compile_context>

<pallas_src>
import functools
import math

import jax
import jax.numpy as jnp
from jax import lax
from jax.experimental import pallas as pl
from jax.experimental.pallas import tpu as pltpu


# -----------------------------------------------------------------------------
# helpers
# -----------------------------------------------------------------------------
def _round_up(x, m):
    return ((x + m - 1) // m) * m


def _pick_row_tile(m, cap=256):
    return min(cap, _round_up(m, 8))


def _pick_chunk(length):
    if length <= 256:
        return length
    for c in range(256, 7, -1):
        if length % c == 0 and c % 8 == 0:
            return c
    return length


class KeyGen:
    def __init__(self, key):
        self._key = key

    def __call__(self):
        self._key, sub = jax.random.split(self._key)
        return sub


def _apply_act(y, act):
    if act is None:
        return y
    if act == "relu":
        return jnp.maximum(y, 0.0)
    if act == "sigmoid":
        return jax.nn.sigmoid(y)
    if act == "silu":
        return y * jax.nn.sigmoid(y)
    raise ValueError(act)


# -----------------------------------------------------------------------------
# Pallas kernel: matmul with fused bias + activation epilogue
#   bf16 MXU operands, f32 accumulation, full-K / full-N blocks, parallel M grid
# -----------------------------------------------------------------------------
def _mm_bias_act_kernel(x_ref, w_ref, b_ref, o_ref, *, act):
    y = jnp.dot(x_ref[...], w_ref[...], preferred_element_type=jnp.float32)
    y = y + b_ref[...]
    o_ref[...] = _apply_act(y, act).astype(o_ref.dtype)


@functools.partial(jax.jit, static_argnames=("act",))
def pallas_matmul_bias_act(x, w, b=None, *, act=None):
    M, K = x.shape
    _, N = w.shape
    tm = _pick_row_tile(M)
    Mp = _round_up(M, tm)
    xb = x.astype(jnp.bfloat16)
    wb = w.astype(jnp.bfloat16)
    if K < 8:                                   # avoid degenerate contraction
        xb = jnp.pad(xb, ((0, 0), (0, 8 - K)))
        wb = jnp.pad(wb, ((0, 8 - K), (0, 0)))
        K = 8
    if Mp != M:
        xb = jnp.pad(xb, ((0, Mp - M), (0, 0)))
    if b is None:
        b = jnp.zeros((N,), jnp.float32)
    out = pl.pallas_call(
        functools.partial(_mm_bias_act_kernel, act=act),
        out_shape=jax.ShapeDtypeStruct((Mp, N), jnp.float32),
        grid_spec=pltpu.PrefetchScalarGridSpec(
            num_scalar_prefetch=0,
            grid=(Mp // tm,),
            in_specs=[pl.BlockSpec((tm, K), lambda i: (i, 0)),
                      pl.BlockSpec((K, N), lambda i: (0, 0)),
                      pl.BlockSpec((1, N), lambda i: (0, 0))],
            out_specs=pl.BlockSpec((tm, N), lambda i: (i, 0))),
        compiler_params=pltpu.CompilerParams(dimension_semantics=("parallel",)),
    )(xb, wb, b.reshape(1, N).astype(jnp.float32))
    return out[:M] if Mp != M else out


# -----------------------------------------------------------------------------
# KxK conv: im2col (glue) + fused matmul
# -----------------------------------------------------------------------------
@functools.partial(jax.jit, static_argnames=("padding", "act"))
def pallas_conv2d(x, w, b, *, padding, act=None):
    # TODO(synk): im2col multiplies activation HBM traffic by kh*kw; a direct
    # shifted-accumulate conv kernel would remove this for large inputs.
    B, H, W, Cin = x.shape
    kh, kw, _, Cout = w.shape
    xp = jnp.pad(x, ((0, 0), (padding, padding), (padding, padding), (0, 0)))
    cols = [xp[:, dy:dy + H, dx:dx + W, :] for dy in range(kh) for dx in range(kw)]
    patches = jnp.concatenate(cols, axis=-1).reshape(B * H * W, kh * kw * Cin)
    y = pallas_matmul_bias_act(patches, w.reshape(kh * kw * Cin, Cout), b, act=act)
    return y.reshape(B, H, W, Cout)


# -----------------------------------------------------------------------------
# Pallas kernel: depthwise 3x3 conv (+ optional fused SiLU)
# -----------------------------------------------------------------------------
def _dwconv3x3_kernel(x_ref, w_ref, b_ref, o_ref, *, act):
    Hp2, Wp2, C = x_ref.shape
    H, W = Hp2 - 2, Wp2 - 2
    x = x_ref[...].astype(jnp.float32)
    w = w_ref[...].astype(jnp.float32)
    acc = jnp.zeros((H, W, C), jnp.float32)
    for dy in range(3):
        for dx in range(3):
            acc = acc + x[dy:dy + H, dx:dx + W, :] * w[dy, dx, :]
    acc = acc + b_ref[0, :]
    if act == "silu":
        acc = acc * jax.nn.sigmoid(acc)
    o_ref[...] = acc.astype(o_ref.dtype)


@functools.partial(jax.jit, static_argnames=("act",))
def pallas_dwconv3x3(x, w, b, *, act=None):
    # TODO(synk): for large H*W*C, tile over H-row strips (halo DMA) so blocks
    # stay well under the scoped-VMEM limit; whole-image blocks are fine at
    # the small shapes used here.
    B, H, W, C = x.shape
    xp = jnp.pad(x, ((0, 0), (1, 1), (1, 1), (0, 0)))
    return pl.pallas_call(
        functools.partial(_dwconv3x3_kernel, act=act),
        out_shape=jax.ShapeDtypeStruct((B, H, W, C), jnp.float32),
        grid_spec=pltpu.PrefetchScalarGridSpec(
            num_scalar_prefetch=0,
            grid=(B,),
            in_specs=[pl.BlockSpec((None, H + 2, W + 2, C), lambda i: (i, 0, 0, 0)),
                      pl.BlockSpec((3, 3, C), lambda i: (0, 0, 0)),
                      pl.BlockSpec((1, C), lambda i: (0, 0))],
            out_specs=pl.BlockSpec((None, H, W, C), lambda i: (i, 0, 0, 0))),
        compiler_params=pltpu.CompilerParams(dimension_semantics=("parallel",)),
    )(xp, w, b.reshape(1, C))


# -----------------------------------------------------------------------------
# Pallas kernels: standalone LayerNorm, LN->matmul, LN*SiLU(z)->matmul fusions
# -----------------------------------------------------------------------------
def _layernorm_kernel(x_ref, g_ref, b_ref, o_ref, *, eps):
    x = x_ref[...].astype(jnp.float32)
    mu = jnp.mean(x, axis=-1, keepdims=True)
    var = jnp.mean((x - mu) ** 2, axis=-1, keepdims=True)
    o_ref[...] = ((x - mu) * lax.rsqrt(var + eps) * g_ref[...] + b_ref[...]
                  ).astype(o_ref.dtype)


@functools.partial(jax.jit, static_argnames=("eps",))
def pallas_layernorm(x2d, gamma, beta, *, eps=1e-5):
    R, C = x2d.shape
    tr = _pick_row_tile(R, cap=512)
    Rp = _round_up(R, tr)
    xp = x2d.astype(jnp.float32)
    if Rp != R:
        xp = jnp.pad(xp, ((0, Rp - R), (0, 0)))
    out = pl.pallas_call(
        functools.partial(_layernorm_kernel, eps=eps),
        out_shape=jax.ShapeDtypeStruct((Rp, C), jnp.float32),
        grid_spec=pltpu.PrefetchScalarGridSpec(
            num_scalar_prefetch=0,
            grid=(Rp // tr,),
            in_specs=[pl.BlockSpec((tr, C), lambda i: (i, 0)),
                      pl.BlockSpec((1, C), lambda i: (0, 0)),
                      pl.BlockSpec((1, C), lambda i: (0, 0))],
            out_specs=pl.BlockSpec((tr, C), lambda i: (i, 0))),
        compiler_params=pltpu.CompilerParams(dimension_semantics=("parallel",)),
    )(xp, gamma.reshape(1, C).astype(jnp.float32),
      beta.reshape(1, C).astype(jnp.float32))
    return out[:R] if Rp != R else out


def _ln_mm_kernel(x_ref, g_ref, bt_ref, w_ref, o_ref, *, eps):
    x = x_ref[...].astype(jnp.float32)
    mu = jnp.mean(x, axis=-1, keepdims=True)
    var = jnp.mean((x - mu) ** 2, axis=-1, keepdims=True)
    xn = (x - mu) * lax.rsqrt(var + eps) * g_ref[...] + bt_ref[...]
    o_ref[...] = jnp.dot(xn.astype(w_ref.dtype), w_ref[...],
                         preferred_element_type=jnp.float32)


@functools.partial(jax.jit, static_argnames=("eps",))
def pallas_ln_matmul(x2d, gamma, beta, w, *, eps):
    M, C = x2d.shape
    N = w.shape[1]
    tm = _pick_row_tile(M)
    Mp = _round_up(M, tm)
    xp = x2d.astype(jnp.float32)
    if Mp != M:
        xp = jnp.pad(xp, ((0, Mp - M), (0, 0)))
    out = pl.pallas_call(
        functools.partial(_ln_mm_kernel, eps=eps),
        out_shape=jax.ShapeDtypeStruct((Mp, N), jnp.float32),
        grid_spec=pltpu.PrefetchScalarGridSpec(
            num_scalar_prefetch=0,
            grid=(Mp // tm,),
            in_specs=[pl.BlockSpec((tm, C), lambda i: (i, 0)),
                      pl.BlockSpec((1, C), lambda i: (0, 0)),
                      pl.BlockSpec((1, C), lambda i: (0, 0)),
                      pl.BlockSpec((C, N), lambda i: (0, 0))],
            out_specs=pl.BlockSpec((tm, N), lambda i: (i, 0))),
        compiler_params=pltpu.CompilerParams(dimension_semantics=("parallel",)),
    )(xp, gamma.reshape(1, C).astype(jnp.float32),
      beta.reshape(1, C).astype(jnp.float32), w.astype(jnp.bfloat16))
    return out[:M] if Mp != M else out


def _lngate_mm_kernel(y_ref, z_ref, g_ref, bt_ref, w_ref, o_ref, *, eps):
    y = y_ref[...].astype(jnp.float32)
    z = z_ref[...].astype(jnp.float32)
    mu = jnp.mean(y, axis=-1, keepdims=True)
    var = jnp.mean((y - mu) ** 2, axis=-1, keepdims=True)
    yn = (y - mu) * lax.rsqrt(var + eps) * g_ref[...] + bt_ref[...]
    gated = yn * (z * jax.nn.sigmoid(z))
    o_ref[...] = jnp.dot(gated.astype(w_ref.dtype), w_ref[...],
                         preferred_element_type=jnp.float32)


@functools.partial(jax.jit, static_argnames=("eps",))
def pallas_lngate_matmul(y2d, z2d, gamma, beta, w, *, eps):
    M, C = y2d.shape
    N = w.shape[1]
    tm = _pick_row_tile(M)
    Mp = _round_up(M, tm)
    yp = y2d.astype(jnp.float32)
    zp = z2d.astype(jnp.float32)
    if Mp != M:
        yp = jnp.pad(yp, ((0, Mp - M), (0, 0)))
        zp = jnp.pad(zp, ((0, Mp - M), (0, 0)))
    out = pl.pallas_call(
        functools.partial(_lngate_mm_kernel, eps=eps),
        out_shape=jax.ShapeDtypeStruct((Mp, N), jnp.float32),
        grid_spec=pltpu.PrefetchScalarGridSpec(
            num_scalar_prefetch=0,
            grid=(Mp // tm,),
            in_specs=[pl.BlockSpec((tm, C), lambda i: (i, 0)),
                      pl.BlockSpec((tm, C), lambda i: (i, 0)),
                      pl.BlockSpec((1, C), lambda i: (0, 0)),
                      pl.BlockSpec((1, C), lambda i: (0, 0)),
                      pl.BlockSpec((C, N), lambda i: (0, 0))],
            out_specs=pl.BlockSpec((tm, N), lambda i: (i, 0))),
        compiler_params=pltpu.CompilerParams(dimension_semantics=("parallel",)),
    )(yp, zp, gamma.reshape(1, C).astype(jnp.float32),
      beta.reshape(1, C).astype(jnp.float32), w.astype(jnp.bfloat16))
    return out[:M] if Mp != M else out


# -----------------------------------------------------------------------------
# Pallas kernel: Mamba selective scan with fused x_proj / dt_proj
#   grid = (rev, layout, B, chunks);  direction k = 2*rev + layout
#   Per chunk: three small bf16 MXU matmuls produce dt/B/C (dt_proj folded into
#   x_proj's dt columns - exact linear composition, its bias applied before
#   softplus), chunk-vectorized exp / outer-product precompute into VMEM
#   tables, register-carried hidden state in a fori_loop, dense chunk store.
#   Reversed directions (k = 2, 3) are handled by a reversed chunk index_map +
#   reversed in-chunk traversal, so outputs land at original positions and no
#   flipped copies are materialized in HBM.
# -----------------------------------------------------------------------------
def _scan_fused_kernel(x_ref, wdt_ref, wb_ref, wc_ref, a_ref, d_ref, bias_ref,
                       o_ref, h_ref, da_ref, dbu_ref, hs_ref):
    T = x_ref.shape[0]
    N = a_ref.shape[0]
    rev = pl.program_id(0)                       # 1 => reversed direction

    @pl.when(pl.program_id(3) == 0)
    def _():
        h_ref[...] = jnp.zeros_like(h_ref)

    x = x_ref[...]                               # (T, D) f32
    xb = x.astype(jnp.bfloat16)

    # fused x_proj (+ folded dt_proj): three small MXU matmuls per chunk
    dt_raw = jnp.dot(xb, wdt_ref[...], preferred_element_type=jnp.float32)
    dt_raw = dt_raw + bias_ref[...]              # (T, D), delta_bias
    bc = jnp.dot(xb, wb_ref[...], preferred_element_type=jnp.float32)   # (T, N)
    cc = jnp.dot(xb, wc_ref[...], preferred_element_type=jnp.float32)   # (T, N)

    # softplus (delta_softplus=True)
    delta = jnp.where(dt_raw > 20.0, dt_raw,
                      jnp.log1p(jnp.exp(jnp.minimum(dt_raw, 20.0))))
    du = delta * x                               # (T, D)
    A = a_ref[...]                               # (N, D)

    # chunk-vectorized precompute (EUP/VPU): exp(delta*A) and B * delta * u
    for n in range(N):
        da_ref[:, n, :] = jnp.exp(delta * A[n:n + 1, :])
        dbu_ref[:, n, :] = bc[:, n:n + 1] * du

    def body(t, h):
        s = t + rev * (T - 1 - 2 * t)            # forward or reversed traversal
        h = da_ref[s] * h + dbu_ref[s]
        hs_ref[s] = h
        return h

    h_ref[...] = lax.fori_loop(0, T, body, h_ref[...])

    ys = d_ref[...] * x                          # D * u skip
    for n in range(N):
        ys = ys + cc[:, n:n + 1] * hs_ref[:, n, :]
    o_ref[...] = ys


@jax.jit
def pallas_scan_fused(xs2, wdt, wb, wc, A_neg, Ds, dt_bias):
    # xs2: (2,B,L,D)  wdt: (4,D,D)  wb/wc: (4,D,N)
    # A_neg: (4,N,D)  Ds, dt_bias: (4,1,D)   direction k = 2*rev + layout
    _, B, L, D = xs2.shape
    K = wdt.shape[0]
    N = wb.shape[-1]
    T = _pick_chunk(L)
    NC = L // T

    def x_idx(r, l, b, c):
        c2 = c + r * (NC - 1 - 2 * c)            # reversed chunk order if rev
        return (l, b, c2, 0)                     # layout 0 = HW, 1 = WH

    def o_idx(r, l, b, c):
        c2 = c + r * (NC - 1 - 2 * c)
        return (2 * r + l, b, c2, 0)

    def w_idx(r, l, b, c):
        return (2 * r + l, 0, 0)

    return pl.pallas_call(
        _scan_fused_kernel,
        out_shape=jax.ShapeDtypeStruct((K, B, L, D), jnp.float32),
        grid_spec=pltpu.PrefetchScalarGridSpec(
            num_scalar_prefetch=0,
            grid=(2, 2, B, NC),
            in_specs=[
                pl.BlockSpec((None, None, T, D), x_idx),
                pl.BlockSpec((None, D, D), w_idx),
                pl.BlockSpec((None, D, N), w_idx),
                pl.BlockSpec((None, D, N), w_idx),
                pl.BlockSpec((None, N, D), w_idx),
                pl.BlockSpec((None, 1, D), w_idx),
                pl.BlockSpec((None, 1, D), w_idx),
            ],
            out_specs=pl.BlockSpec((None, None, T, D), o_idx),
            scratch_shapes=[pltpu.VMEM((N, D), jnp.float32),
                            pltpu.VMEM((T, N, D), jnp.float32),
                            pltpu.VMEM((T, N, D), jnp.float32),
                            pltpu.VMEM((T, N, D), jnp.float32)]),
        compiler_params=pltpu.CompilerParams(
            dimension_semantics=("parallel", "parallel", "parallel", "arbitrary")),
    )(xs2.astype(jnp.float32), wdt.astype(jnp.bfloat16), wb.astype(jnp.bfloat16),
      wc.astype(jnp.bfloat16), A_neg.astype(jnp.float32),
      Ds.astype(jnp.float32), dt_bias.astype(jnp.float32))


# -----------------------------------------------------------------------------
# Plain-JAX glue (BatchNorm uses batch statistics - PyTorch default train mode)
# -----------------------------------------------------------------------------
def batchnorm2d(x, gamma, beta, eps=1e-5):
    mu = jnp.mean(x, axis=(0, 1, 2), keepdims=True)
    var = jnp.mean((x - mu) ** 2, axis=(0, 1, 2), keepdims=True)
    return (x - mu) * lax.rsqrt(var + eps) * gamma + beta


def gelu(x):
    # erf-based GELU kept at XLA level (matches nn.GELU exactly).
    return jax.nn.gelu(x, approximate=False)


# -----------------------------------------------------------------------------
# SS2D
# -----------------------------------------------------------------------------
def ss2d_forward(p, x, ln_g, ln_b, ln_eps):
    B, H, W, Cm = x.shape
    D = p["in_proj_w"].shape[1] // 2
    N = p["A_neg"].shape[1]
    R = p["dt_proj_w"].shape[1]
    L = H * W

    # ln_1 fused into in_proj prologue
    xz = pallas_ln_matmul(x.reshape(-1, Cm), ln_g, ln_b, p["in_proj_w"],
                          eps=ln_eps).reshape(B, H, W, 2 * D)
    xc, z = xz[..., :D], xz[..., D:]
    xc = pallas_dwconv3x3(xc, p["conv_w"], p["conv_b"], act="silu")

    x_hw = xc.reshape(B, L, D)
    x_wh = jnp.transpose(xc, (0, 2, 1, 3)).reshape(B, L, D)
    xs2 = jnp.stack([x_hw, x_wh], axis=0)                     # (2, B, L, D)

    # fold dt_proj into x_proj's dt columns (exact - both are bias-free linears;
    # dt_proj's bias is applied inside the scan kernel as delta_bias)
    wdt = jnp.einsum("kdr,kre->kde", p["x_proj_w"][:, :, :R], p["dt_proj_w"])
    wb = p["x_proj_w"][:, :, R:R + N]
    wc = p["x_proj_w"][:, :, R + N:]

    out_y = pallas_scan_fused(xs2, wdt, wb, wc, p["A_neg"], p["Ds"],
                              p["dt_bias"])                    # (4, B, L, D)

    # reversed directions are already written at original positions in-kernel
    y_hw = out_y[0] + out_y[2]
    y_wh = out_y[1] + out_y[3]
    y_wh = jnp.transpose(y_wh.reshape(B, W, H, D), (0, 2, 1, 3)).reshape(B, L, D)
    y = y_hw + y_wh

    # out_norm + SiLU(z) gate fused into out_proj prologue
    out = pallas_lngate_matmul(y.reshape(B * L, D), z.reshape(B * L, D),
                               p["out_norm_g"], p["out_norm_b"],
                               p["out_proj_w"], eps=1e-5)
    return out.reshape(B, H, W, Cm)


# -----------------------------------------------------------------------------
# FreBlock
# -----------------------------------------------------------------------------
def freblock_forward(p, x):
    B, H, W, C = x.shape
    # TODO(synk): rfft2/irfft2 have no Pallas equivalent; computed with jnp.fft.
    xf = jnp.fft.rfft2(x, axes=(1, 2))
    mag, pha = jnp.abs(xf), jnp.angle(xf)
    Wf = mag.shape[2]

    def proc(m, w, b, g, be):
        m = pallas_matmul_bias_act(m.reshape(-1, C), w, b).reshape(B, H, Wf, C)
        return jax.nn.relu(batchnorm2d(m, g, be))

    mag = proc(mag, p["p1_w"], p["p1_b"], p["bn1_g"], p["bn1_b"])
    pha = proc(pha, p["p2_w"], p["p2_b"], p["bn2_g"], p["bn2_b"])

    def att(m, w7, b7):
        avg = jnp.mean(m, axis=-1, keepdims=True)
        mx = jnp.max(m, axis=-1, keepdims=True)
        return pallas_conv2d(jnp.concatenate([avg, mx], axis=-1), w7, b7,
                             padding=3, act="sigmoid")

    mag = mag * att(mag, p["m7_w"], p["m7_b"])
    pha = pha * att(pha, p["h7_w"], p["h7_b"])

    real = mag * jnp.cos(pha)
    imag = mag * jnp.sin(pha)
    out = jnp.fft.irfft2(real + 1j * imag, s=(H, W), axes=(1, 2))
    return out.astype(x.dtype)


# -----------------------------------------------------------------------------
# CAB (conv-attention block)
# -----------------------------------------------------------------------------
def cab_forward(p, x):
    t = gelu(pallas_conv2d(x, p["c1_w"], p["c1_b"], padding=1))
    t = pallas_conv2d(t, p["c2_w"], p["c2_b"], padding=1)
    pooled = jnp.mean(t, axis=(1, 2))                          # AdaptiveAvgPool2d(1)
    a = pallas_matmul_bias_act(pooled, p["ca1_w"], p["ca1_b"], act="relu")
    a = pallas_matmul_bias_act(a, p["ca2_w"], p["ca2_b"], act="sigmoid")
    return t * a[:, None, None, :]


# -----------------------------------------------------------------------------
# VSSBlock / VSSLayer
# -----------------------------------------------------------------------------
def vss_block_forward(p, x):
    B, H, W, C = x.shape
    half = C // 2
    left, right = x[..., :half], x[..., half:]

    # drop_path(0.) == identity; ln_1 (eps=1e-6) is fused into SS2D's in_proj
    right_out = right + ss2d_forward(p["ss2d"], right, p["ln1_g"], p["ln1_b"], 1e-6)

    left_out = freblock_forward(p["fre"], left)

    output = jnp.concatenate([left_out, right_out], axis=-1)    # channel concat

    # proj: dwconv3x3 -> GELU -> BN -> 1x1 -> GELU -> BN -> 1x1 -> BN
    t = pallas_dwconv3x3(output, p["proj_dw_w"], p["proj_dw_b"], act=None)
    t = batchnorm2d(gelu(t), p["proj_bn1_g"], p["proj_bn1_b"])
    t = pallas_matmul_bias_act(t.reshape(B * H * W, C), p["proj_c1_w"], p["proj_c1_b"])
    t = batchnorm2d(gelu(t).reshape(B, H, W, -1), p["proj_bn2_g"], p["proj_bn2_b"])
    t = pallas_matmul_bias_act(t.reshape(B * H * W, -1), p["proj_c2_w"], p["proj_c2_b"])
    t = batchnorm2d(t.reshape(B, H, W, C), p["proj_bn3_g"], p["proj_bn3_b"])

    out = (output + t) + x

    ln2 = pallas_layernorm(out.reshape(-1, C), p["ln2_g"], p["ln2_b"],
                           eps=1e-5).reshape(B, H, W, C)
    out = out + cab_forward(p["cab"], ln2)
    return out


def vss_layer_forward(blocks_params, x):
    for p in blocks_params:
        x = vss_block_forward(p, x)
    return x   # downsample=None


# -----------------------------------------------------------------------------
# deterministic parameter init (synthetic, matching module shapes)
# -----------------------------------------------------------------------------
def init_ss2d(kg, d_model, d_state=16, expand=2.0):
    d_inner = int(expand * d_model)
    dt_rank = math.ceil(d_model / 16)
    K = 4
    w = lambda *s: jax.random.normal(kg(), s, jnp.float32) * 0.05
    A = jnp.tile(jnp.arange(1, d_state + 1, dtype=jnp.float32)[None, :, None],
                 (K, 1, d_inner))                     # A = -exp(log(1..N))
    dt = jnp.exp(jax.random.uniform(kg(), (K, d_inner)) *
                 (math.log(0.1) - math.log(0.001)) + math.log(0.001))
    dt = jnp.maximum(dt, 1e-4)
    inv_dt = dt + jnp.log(-jnp.expm1(-dt))
    return dict(
        in_proj_w=w(d_model, 2 * d_inner),
        conv_w=w(3, 3, d_inner), conv_b=jnp.zeros((d_inner,), jnp.float32),
        x_proj_w=w(K, d_inner, dt_rank + 2 * d_state),
        dt_proj_w=w(K, dt_rank, d_inner),
        dt_bias=inv_dt.reshape(K, 1, d_inner).astype(jnp.float32),
        A_neg=(-A).astype(jnp.float32),
        Ds=jnp.ones((K, 1, d_inner), jnp.float32),
        out_norm_g=jnp.ones((d_inner,), jnp.float32),
        out_norm_b=jnp.zeros((d_inner,), jnp.float32),
        out_proj_w=w(d_inner, d_model),
    )


def init_vss_block(kg, dim, d_state=16):
    half = dim // 2
    inner = max(16, dim // 8)
    sq = max(1, dim // 30)
    w = lambda *s: jax.random.normal(kg(), s, jnp.float32) * 0.05
    zeros = lambda *s: jnp.zeros(s, jnp.float32)
    ones = lambda *s: jnp.ones(s, jnp.float32)
    return dict(
        ln1_g=ones(half), ln1_b=zeros(half),
        ss2d=init_ss2d(kg, half, d_state),
        fre=dict(p1_w=w(half, half), p1_b=zeros(half), bn1_g=ones(half), bn1_b=zeros(half),
                 p2_w=w(half, half), p2_b=zeros(half), bn2_g=ones(half), bn2_b=zeros(half),
                 m7_w=w(7, 7, 2, 1), m7_b=zeros(1),
                 h7_w=w(7, 7, 2, 1), h7_b=zeros(1)),
        proj_dw_w=w(3, 3, dim), proj_dw_b=zeros(dim),
        proj_bn1_g=ones(dim), proj_bn1_b=zeros(dim),
        proj_c1_w=w(dim, inner), proj_c1_b=zeros(inner),
        proj_bn2_g=ones(inner), proj_bn2_b=zeros(inner),
        proj_c2_w=w(inner, dim), proj_c2_b=zeros(dim),
        proj_bn3_g=ones(dim), proj_bn3_b=zeros(dim),
        ln2_g=ones(dim), ln2_b=zeros(dim),
        cab=dict(c1_w=w(3, 3, dim, dim // 3), c1_b=zeros(dim // 3),
                 c2_w=w(3, 3, dim // 3, dim), c2_b=zeros(dim),
                 ca1_w=w(dim, sq), ca1_b=zeros(sq),
                 ca2_w=w(sq, dim), ca2_b=zeros(dim)),
    )


# -----------------------------------------------------------------------------
if __name__ == "__main__":
    dim, depth, d_state = 32, 2, 16
    B, H, W = 2, 8, 8

    kg = KeyGen(jax.random.PRNGKey(0))
    blocks_params = [init_vss_block(kg, dim, d_state) for _ in range(depth)]
    x = jax.random.normal(kg(), (B, H, W, dim), jnp.float32)

    fwd = jax.jit(vss_layer_forward)
    out = jax.block_until_ready(fwd(blocks_params, x))

    assert out.shape == (B, H, W, dim)
    assert bool(jnp.all(jnp.isfinite(out)))
    print("KERNEL_OK")
</pallas_src>

<mosaic_0001>
module attributes {stable_mosaic.version = 11 : i64} {
  func.func @_ln_mm_kernel(%arg0: i32, %arg1: memref<128x16xf32, #tpu.memory_space<vmem>>, %arg2: memref<1x16xf32, #tpu.memory_space<vmem>>, %arg3: memref<1x16xf32, #tpu.memory_space<vmem>>, %arg4: memref<16x64xbf16, #tpu.memory_space<vmem>>, %arg5: memref<128x64xf32, #tpu.memory_space<vmem>>) attributes {dimension_semantics = [#tpu.dimension_semantics<parallel>], iteration_bounds = array<i64: 1>, scalar_prefetch = 0 : i64, scratch_operands = 0 : i64, tpu.core_type = #tpu.core_type<tc>, window_params = [{transform_indices = @transform_0, window_bounds = array<i64: 128, 16>}, {pipeline_mode = #tpu.pipeline_mode<synchronous>, transform_indices = @transform_1, window_bounds = array<i64: 1, 16>}, {pipeline_mode = #tpu.pipeline_mode<synchronous>, transform_indices = @transform_2, window_bounds = array<i64: 1, 16>}, {pipeline_mode = #tpu.pipeline_mode<synchronous>, transform_indices = @transform_3, window_bounds = array<i64: 16, 64>}, {transform_indices = @transform_4, window_bounds = array<i64: 128, 64>}]} {
    %c0 = arith.constant 0 : index
    %c0_0 = arith.constant 0 : index
    %0 = vector.load %arg1[%c0, %c0_0] : memref<128x16xf32, #tpu.memory_space<vmem>>, vector<128x16xf32>
    %cst = arith.constant dense<0.000000e+00> : vector<128xf32>
    %1 = vector.multi_reduction <add>, %0, %cst [1] : vector<128x16xf32> to vector<128xf32>
    %2 = vector.shape_cast %1 : vector<128xf32> to vector<128x1xf32>
    %cst_1 = arith.constant 1.600000e+01 : f32
    %3 = vector.broadcast %cst_1 : f32 to vector<128x1xf32>
    %4 = arith.divf %2, %3 : vector<128x1xf32>
    %5 = vector.broadcast %4 : vector<128x1xf32> to vector<128x16xf32>
    %6 = arith.subf %0, %5 : vector<128x16xf32>
    %7 = arith.mulf %6, %6 : vector<128x16xf32>
    %cst_2 = arith.constant dense<0.000000e+00> : vector<128xf32>
    %8 = vector.multi_reduction <add>, %7, %cst_2 [1] : vector<128x16xf32> to vector<128xf32>
    %9 = vector.shape_cast %8 : vector<128xf32> to vector<128x1xf32>
    %cst_3 = arith.constant 1.600000e+01 : f32
    %10 = vector.broadcast %cst_3 : f32 to vector<128x1xf32>
    %11 = arith.divf %9, %10 : vector<128x1xf32>
    %12 = vector.broadcast %4 : vector<128x1xf32> to vector<128x16xf32>
    %13 = arith.subf %0, %12 : vector<128x16xf32>
    %cst_4 = arith.constant 9.99999997E-7 : f32
    %14 = vector.broadcast %cst_4 : f32 to vector<128x1xf32>
    %15 = arith.addf %11, %14 : vector<128x1xf32>
    %16 = math.rsqrt %15 : vector<128x1xf32>
    %17 = vector.broadcast %16 : vector<128x1xf32> to vector<128x16xf32>
    %18 = arith.mulf %13, %17 : vector<128x16xf32>
    %c0_5 = arith.constant 0 : index
    %c0_6 = arith.constant 0 : index
    %19 = vector.load %arg2[%c0_5, %c0_6] : memref<1x16xf32, #tpu.memory_space<vmem>>, vector<1x16xf32>
    %20 = vector.broadcast %19 : vector<1x16xf32> to vector<128x16xf32>
    %21 = arith.mulf %18, %20 : vector<128x16xf32>
    %c0_7 = arith.constant 0 : index
    %c0_8 = arith.constant 0 : index
    %22 = vector.load %arg3[%c0_7, %c0_8] : memref<1x16xf32, #tpu.memory_space<vmem>>, vector<1x16xf32>
    %23 = vector.broadcast %22 : vector<1x16xf32> to vector<128x16xf32>
    %24 = arith.addf %21, %23 : vector<128x16xf32>
    %25 = arith.truncf %24 : vector<128x16xf32> to vector<128x16xbf16>
    %c0_9 = arith.constant 0 : index
    %c0_10 = arith.constant 0 : index
    %26 = vector.load %arg4[%c0_9, %c0_10] : memref<16x64xbf16, #tpu.memory_space<vmem>>, vector<16x64xbf16>
    %cst_11 = arith.constant dense<0.000000e+00> : vector<128x64xf32>
    %27 = tpu.matmul %25, %26, %cst_11 {dimension_numbers = #tpu.dot_dimension_numbers<[1], [0], [0], [1], [0, 0, 1, 1], [], []>} : vector<128x16xbf16>, vector<16x64xbf16>, vector<128x64xf32> -> vector<128x64xf32>
    %c0_12 = arith.constant 0 : index
    %c0_13 = arith.constant 0 : index
    %28 = vector.load %arg5[%c0_12, %c0_13] : memref<128x64xf32, #tpu.memory_space<vmem>>, vector<128x64xf32>
    tpu.vector_store %arg5[%c0_12, %c0_13], %27 {strides = array<i32>} : memref<128x64xf32, #tpu.memory_space<vmem>>, vector<128x64xf32>,
    return
  }
  func.func @transform_0(%arg0: i32) -> (i32, i32) {
    %c0_i32 = arith.constant 0 : i32
    %c0_i32_0 = arith.constant 0 : i32
    return %arg0, %c0_i32 : i32, i32
  }
  func.func @transform_1(%arg0: i32) -> (i32, i32) {
    %c0_i32 = arith.constant 0 : i32
    %c0_i32_0 = arith.constant 0 : i32
    %c0_i32_1 = arith.constant 0 : i32
    return %c0_i32, %c0_i32_0 : i32, i32
  }
  func.func @transform_2(%arg0: i32) -> (i32, i32) {
    %c0_i32 = arith.constant 0 : i32
    %c0_i32_0 = arith.constant 0 : i32
    %c0_i32_1 = arith.constant 0 : i32
    return %c0_i32, %c0_i32_0 : i32, i32
  }
  func.func @transform_3(%arg0: i32) -> (i32, i32) {
    %c0_i32 = arith.constant 0 : i32
    %c0_i32_0 = arith.constant 0 : i32
    %c0_i32_1 = arith.constant 0 : i32
    return %c0_i32, %c0_i32_0 : i32, i32
  }
  func.func @transform_4(%arg0: i32) -> (i32, i32) {
    %c0_i32 = arith.constant 0 : i32
    %c0_i32_0 = arith.constant 0 : i32
    return %arg0, %c0_i32 : i32, i32
  }
}

</mosaic_0001>

<bundles_post_ra>
// kernel: pallas_ln_matmul.1
= control target key start
LH: loop header
LB: loop body
LE: loop exit
PB: predicated region body
PF: predicated region fallthrough
CT: control target
= control target key end

     0   :  { %vm34_vm0 = vcmask 130048   ;;  %v597_v32 = vmov 16.0   ;;  %s1251_s0 = inlined_call_operand.vmem [shape: f32[128,16], index: 0, kind: input, shape index: {}]   ;;  %s1252_s1 = inlined_call_operand.vmem [shape: f32[1,16], index: 1, kind: input, shape index: {}]   ;;  %s1253_s2 = inlined_call_operand.vmem [shape: f32[1,16], index: 2, kind: input, shape index: {}]   ;;  %s1254_s3 = inlined_call_operand.vmem [shape: bf16[16,64], index: 3, kind: input, shape index: {}]   ;;  %s1255_s4 = inlined_call_operand.vmem [shape: f32[128,64], index: 4, kind: output, shape index: {}]  }
   0x1   :  { %v30_v0 = vld [vmem:[%s1251_s0 + $0x60] sm:$0xff]  ;;  %v641_v6 = vld [vmem:[%s1251_s0 + $0x68] sm:$0xff]  ;;  %v672_v14 = vld [vmem:[%s1251_s0 + $0x50] sm:$0xff]  ;;  %563 = vrcp.f32 %v597_v32 }
   0x2   :  { %v26_v1 = vld [vmem:[%s1251_s0 + $0x40] sm:$0xff]  ;;  %v71_v3 = vsel %vm34_vm0, %v30_v0, 0.0  ;;  %v646_v7 = vld [vmem:[%s1251_s0 + $0x48] sm:$0xff]  ;;  %v74_v9 = vsel %vm34_vm0, %v641_v6, 0.0  ;;  %v65_v17 = vsel %vm34_vm0, %v672_v14, 0.0  ;;  %v683_v18 = vld [vmem:[%s1251_s0 + $0x58] sm:$0xff] }
   0x3   :  { %v632_v2 = vld [vmem:[%s1251_s0] sm:$0xff]  ;;  %v59_v4 = vsel %vm34_vm0, %v26_v1, 0.0  ;;  %72 = vadd.xlane.f32.xlu1 %v71_v3  ;;  %v651_v8 = vld [vmem:[%s1251_s0 + $0x8] sm:$0xff]  ;;  %v62_v10 = vsel %vm34_vm0, %v646_v7, 0.0  ;;  %v688_v19 = vld [vmem:[%s1251_s0 + $0x70] sm:$0xff]  ;;  %v68_v21 = vsel %vm34_vm0, %v683_v18, 0.0 }
   0x4   :  { %v35_v5 = vsel %vm34_vm0, %v632_v2, 0.0  ;;  %60 = vadd.xlane.f32.xlu0 %v59_v4  ;;  %v38_v11 = vsel %vm34_vm0, %v651_v8, 0.0  ;;  %v662_v12 = vld [vmem:[%s1251_s0 + $0x20] sm:$0xff]  ;;  %v667_v13 = vld [vmem:[%s1251_s0 + $0x28] sm:$0xff]  ;;  %v693_v20 = vld [vmem:[%s1251_s0 + $0x78] sm:$0xff]  ;;  %v77_v22 = vsel %vm34_vm0, %v688_v19, 0.0 }
   0x5   :  { %36 = vadd.xlane.f32.xlu2 %v35_v5  ;;  %v47_v15 = vsel %vm34_vm0, %v662_v12, 0.0  ;;  %v50_v16 = vsel %vm34_vm0, %v667_v13, 0.0  ;;  %v80_v23 = vsel %vm34_vm0, %v693_v20, 0.0  ;;  %v704_v24 = vld [vmem:[%s1251_s0 + $0x10] sm:$0xff]  ;;  %v709_v25 = vld [vmem:[%s1251_s0 + $0x18] sm:$0xff] }
   0x6   :  { %v714_v26 = vld [vmem:[%s1251_s0 + $0x30] sm:$0xff]  ;;  %v41_v27 = vsel %vm34_vm0, %v704_v24, 0.0  ;;  %v44_v28 = vsel %vm34_vm0, %v709_v25, 0.0  ;;  %v725_v30 = vld [vmem:[%s1251_s0 + $0x38] sm:$0xff] }
   0x7   :  { %v53_v29 = vsel %vm34_vm0, %v714_v26, 0.0  ;;  %v56_v31 = vsel %vm34_vm0, %v725_v30, 0.0  ;;  %v564_v33 = vpop.eup %563 }
   0x8   :  { %v84_v34 = vmul.f32 16.0, %v564_v33  ;;  %vm88_vm1 = vweird.f32 %v564_v33 }
   0xa   :  { %v85_v35 = vsub.f32 1.0, %v84_v34 }
   0xb   :  { %75 = vadd.xlane.f32.xlu1 %v74_v9 }
   0xc   :  { %63 = vadd.xlane.f32.xlu0 %v62_v10  ;;  %v86_v36 = vmul.f32 %v564_v33, %v85_v35 }
   0xd   :  { %39 = vadd.xlane.f32.xlu2 %v38_v11 }
   0xe   :  { %v87_v37 = vadd.f32 %v564_v33, %v86_v36 }
  0x10   :  { %v729_v38 = vsel %vm88_vm1, %v564_v33, %v87_v37 }
  0x13   :  { %51 = vadd.xlane.f32.xlu1 %v50_v16 }
  0x14   :  { %48 = vadd.xlane.f32.xlu0 %v47_v15 }
  0x15   :  { %66 = vadd.xlane.f32.xlu2 %v65_v17 }
  0x1b   :  { %78 = vadd.xlane.f32.xlu1 %v77_v22 }
  0x1c   :  { %69 = vadd.xlane.f32.xlu0 %v68_v21 }
  0x1d   :  { %81 = vadd.xlane.f32.xlu2 %v80_v23 }
  0x23   :  { %45 = vadd.xlane.f32.xlu1 %v44_v28 }
  0x24   :  { %42 = vadd.xlane.f32.xlu0 %v41_v27 }
  0x25   :  { %54 = vadd.xlane.f32.xlu2 %v53_v29 }
  0x2c   :  { %57 = vadd.xlane.f32.xlu0 %v56_v31 }
  0x76   :  { %v73_v39 = vpop.xlane.xlu1 %72 }
  0x77   :  { %v61_v40 = vpop.xlane.xlu0 %60  ;;  %v102_v41 = vmul.f32 %v729_v38, %v73_v39 }
  0x78   :  { %v98_v42 = vmul.f32 %v729_v38, %v61_v40  ;;  %v37_v43 = vpop.xlane.xlu2 %36 }
  0x79   :  { %v733_v44 = vsub.f32 %v30_v0, %v102_v41  ;;  %v90_v56 = vmul.f32 %v729_v38, %v37_v43 }
  0x7a   :  { %v735_v45 = vsub.f32 %v26_v1, %v98_v42 }
  0x7b   :  { %v134_v47 = vmul.f32 %v733_v44, %v733_v44  ;;  %v763_v63 = vsub.f32 %v632_v2, %v90_v56 }
  0x7c   :  { %v130_v46 = vmul.f32 %v735_v45, %v735_v45 }
  0x7d   :  { %v174_v49 = vsel %vm34_vm0, %v134_v47, 0.0  ;;  %v122_v10 = vmul.f32 %v763_v63, %v763_v63 }
  0x7e   :  { %v162_v48 = vsel %vm34_vm0, %v130_v46, 0.0  ;;  %v76_v50 = vpop.xlane.xlu1 %75  ;;  %175 = vadd.xlane.f32.xlu0 %v174_v49 }
  0x7f   :  { %v64_v51 = vpop.xlane.xlu0 %63  ;;  %163 = vadd.xlane.f32.xlu1 %v162_v48  ;;  %v103_v52 = vmul.f32 %v729_v38, %v76_v50 }
  0x80   :  { %v99_v53 = vmul.f32 %v729_v38, %v64_v51  ;;  %v40_v54 = vpop.xlane.xlu2 %39 }
  0x81   :  { %v91_v55 = vmul.f32 %v729_v38, %v40_v54  ;;  %v748_v57 = vsub.f32 %v641_v6, %v103_v52 }
  0x82   :  { %v751_v58 = vsub.f32 %v646_v7, %v99_v53 }
  0x83   :  { %v754_v59 = vsub.f32 %v651_v8, %v91_v55  ;;  %v135_v60 = vmul.f32 %v748_v57, %v748_v57 }
  0x84   :  { %v131_v61 = vmul.f32 %v751_v58, %v751_v58 }
  0x85   :  { %v123_v62 = vmul.f32 %v754_v59, %v754_v59  ;;  %v177_v0 = vsel %vm34_vm0, %v135_v60, 0.0 }
  0x86   :  { %v165_v1 = vsel %vm34_vm0, %v131_v61, 0.0  ;;  %v52_v5 = vpop.xlane.xlu1 %51 }
  0x87   :  { %v49_v3 = vpop.xlane.xlu0 %48  ;;  %178 = vadd.xlane.f32.xlu1 %v177_v0  ;;  %166 = vadd.xlane.f32.xlu2 %v165_v1  ;;  %v141_v4 = vsel %vm34_vm0, %v123_v62, 0.0  ;;  %v95_v8 = vmul.f32 %v729_v38, %v52_v5 }
  0x88   :  { %v94_v6 = vmul.f32 %v729_v38, %v49_v3  ;;  %142 = vadd.xlane.f32.xlu0 %v141_v4  ;;  %v67_v7 = vpop.xlane.xlu2 %66 }
  0x89   :  { %v100_v9 = vmul.f32 %v729_v38, %v67_v7  ;;  %v780_v15 = vsub.f32 %v667_v13, %v95_v8 }
  0x8a   :  { %v772_v2 = vsub.f32 %v662_v12, %v94_v6  ;;  %v138_v12 = vsel %vm34_vm0, %v122_v10, 0.0 }
  0x8b   :  { %v777_v11 = vsub.f32 %v672_v14, %v100_v9  ;;  %v127_v29 = vmul.f32 %v780_v15, %v780_v15 }
  0x8c   :  { %v126_v16 = vmul.f32 %v772_v2, %v772_v2 }
  0x8d   :  { %v132_v17 = vmul.f32 %v777_v11, %v777_v11  ;;  %v153_v36 = vsel %vm34_vm0, %v127_v29, 0.0 }
  0x8e   :  { %v150_v21 = vsel %vm34_vm0, %v126_v16, 0.0  ;;  %v79_v14 = vpop.xlane.xlu1 %78  ;;  %v556_v16 = vld [vmem:[%s1254_s3] sm:$0xff] }
  0x8f   :  { %v70_v22 = vpop.xlane.xlu0 %69  ;;  %151 = vadd.xlane.f32.xlu1 %v150_v21  ;;  %139 = vadd.xlane.f32.xlu2 %v138_v12  ;;  %v168_v23 = vsel %vm34_vm0, %v132_v17, 0.0  ;;  %v104_v28 = vmul.f32 %v729_v38, %v79_v14 }
  0x90   :  { %v101_v27 = vmul.f32 %v729_v38, %v70_v22  ;;  %169 = vadd.xlane.f32.xlu0 %v168_v23  ;;  %v82_v13 = vpop.xlane.xlu2 %81  ;;  %558 = vmatpush.bf16.msra.mxu2 %v556_v16 }
  0x91   :  { %v105_v31 = vmul.f32 %v729_v38, %v82_v13  ;;  %v801_v34 = vsub.f32 %v688_v19, %v104_v28  ;;  %559 = vmatpush.bf16.msra.mxu3 %v556_v16  ;;  %481 = vmatpush.bf16.msra.mxu0 %v556_v16 }
  0x92   :  { %v795_v32 = vsub.f32 %v683_v18, %v101_v27  ;;  %557 = vmatpush.bf16.msra.mxu1 %v556_v16 }
  0x93   :  { %v798_v33 = vsub.f32 %v693_v20, %v105_v31  ;;  %v136_v43 = vmul.f32 %v801_v34, %v801_v34 }
  0x94   :  { %v133_v35 = vmul.f32 %v795_v32, %v795_v32 }
  0x95   :  { %v137_v37 = vmul.f32 %v798_v33, %v798_v33  ;;  %v180_v51 = vsel %vm34_vm0, %v136_v43, 0.0 }
  0x96   :  { %v171_v39 = vsel %vm34_vm0, %v133_v35, 0.0  ;;  %v46_v20 = vpop.xlane.xlu1 %45 }
  0x97   :  { %172 = vadd.xlane.f32.xlu1 %v171_v39  ;;  %v43_v40 = vpop.xlane.xlu0 %42  ;;  %154 = vadd.xlane.f32.xlu2 %v153_v36  ;;  %v183_v18 = vsel %vm34_vm0, %v137_v37, 0.0  ;;  %v93_v42 = vmul.f32 %v729_v38, %v46_v20 }
  0x98   :  { %v92_v41 = vmul.f32 %v729_v38, %v43_v40  ;;  %184 = vadd.xlane.f32.xlu0 %v183_v18  ;;  %v55_v19 = vpop.xlane.xlu2 %54 }
  0x99   :  { %v96_v46 = vmul.f32 %v729_v38, %v55_v19  ;;  %v822_v49 = vsub.f32 %v709_v25, %v93_v42 }
  0x9a   :  { %v816_v47 = vsub.f32 %v704_v24, %v92_v41 }
  0x9b   :  { %v819_v48 = vsub.f32 %v714_v26, %v96_v46  ;;  %v125_v25 = vmul.f32 %v822_v49, %v822_v49 }
  0x9c   :  { %v124_v50 = vmul.f32 %v816_v47, %v816_v47 }
  0x9d   :  { %v128_v52 = vmul.f32 %v819_v48, %v819_v48  ;;  %v147_v60 = vsel %vm34_vm0, %v125_v25, 0.0 }
  0x9e   :  { %v144_v53 = vsel %vm34_vm0, %v124_v50, 0.0 }
  0x9f   :  { %145 = vadd.xlane.f32.xlu1 %v144_v53  ;;  %v58_v54 = vpop.xlane.xlu0 %57  ;;  %181 = vadd.xlane.f32.xlu2 %v180_v51  ;;  %v156_v24 = vsel %vm34_vm0, %v128_v52, 0.0 }
  0xa0   :  { %v97_v26 = vmul.f32 %v729_v38, %v58_v54  ;;  %157 = vadd.xlane.f32.xlu0 %v156_v24 }
  0xa2   :  { %v835_v55 = vsub.f32 %v725_v30, %v97_v26 }
  0xa4   :  { %v129_v56 = vmul.f32 %v835_v55, %v835_v55 }
  0xa6   :  { %v159_v61 = vsel %vm34_vm0, %v129_v56, 0.0 }
  0xa7   :  { %160 = vadd.xlane.f32.xlu1 %v159_v61  ;;  %148 = vadd.xlane.f32.xlu2 %v147_v60 }
  0xf1   :  { %v176_v0 = vpop.xlane.xlu0 %175 }
  0xf2   :  { %v164_v62 = vpop.xlane.xlu1 %163  ;;  %v198_v3 = vmul.f32 %v176_v0, %v729_v38 }
  0xf3   :  { %v194_v1 = vmul.f32 %v164_v62, %v729_v38 }
  0xf4   :  { %v214_v5 = vadd.f32 1e-06, %v198_v3 }
  0xf5   :  { %v210_v4 = vadd.f32 1e-06, %v194_v1 }
  0xf6   :  { %vm344_vm6 = vweird.f32 %v214_v5 }
  0xf7   :  { %565 = vrsqrt.f32 %v210_v4  ;;  %vm304_vm4 = vweird.f32 %v210_v4 }
  0xf8   :  { %567 = vrsqrt.f32 %v214_v5 }
  0xfa   :  { %v179_v30 = vpop.xlane.xlu1 %178  ;;  %v167_v6 = vpop.xlane.xlu2 %166 }
  0xfb   :  { %v199_v7 = vmul.f32 %v179_v30, %v729_v38  ;;  %v143_v8 = vpop.xlane.xlu0 %142  ;;  %v195_v9 = vmul.f32 %v167_v6, %v729_v38 }
  0xfc   :  { %v187_v10 = vmul.f32 %v143_v8, %v729_v38 }
  0xfd   :  { %v849_v17 = vpop.eup %565  ;;  %v851_v21 = vadd.f32 1e-06, %v199_v7  ;;  %v853_v12 = vadd.f32 1e-06, %v195_v9 }
  0xfe   :  { %v855_v22 = vpop.eup %567  ;;  %v299_v23 = vmul.f32 %v849_v17, %v210_v4  ;;  %v858_v14 = vadd.f32 1e-06, %v187_v10  ;;  %vm305_vm2 = vweird.f32 %v849_v17 }
  0xff   :  { %v339_v27 = vmul.f32 %v855_v22, %v214_v5  ;;  %569 = vrsqrt.f32 %v851_v21  ;;  %vm345_vm3 = vweird.f32 %v855_v22  ;;  %vm892_vm5 = vmor %vm304_vm4, %vm305_vm2  ;;  %vm354_vm8 = vweird.f32 %v851_v21 }
 0x100   :  { %v300_v13 = vmul.f32 %v849_v17, %v299_v23  ;;  %571 = vrsqrt.f32 %v858_v14  ;;  %vm899_vm7 = vmor %vm344_vm6, %vm345_vm3  ;;  %vm234_vm9 = vweird.f32 %v858_v14  ;;  %vm314_vm11 = vweird.f32 %v853_v12 }
 0x101   :  { %v340_v28 = vmul.f32 %v855_v22, %v339_v27  ;;  %573 = vrsqrt.f32 %v853_v12 }
 0x102   :  { %v301_v29 = vmul.f32 0.5, %v300_v13  ;;  %v152_v31 = vpop.xlane.xlu1 %151  ;;  %v140_v35 = vpop.xlane.xlu2 %139 }
 0x103   :  { %v341_v36 = vmul.f32 0.5, %v340_v28  ;;  %v190_v37 = vmul.f32 %v152_v31, %v729_v38  ;;  %v170_v39 = vpop.xlane.xlu0 %169  ;;  %v186_v40 = vmul.f32 %v140_v35, %v729_v38 }
 0x104   :  { %v302_v18 = vsub.f32 1.5, %v301_v29  ;;  %v196_v20 = vmul.f32 %v170_v39, %v729_v38  ;;  %v928_v29 = vld [vmem:[%s1252_s1] ss:$0 sm:$0xff] }
 0x105   :  { %v869_v41 = vpop.eup %569  ;;  %v342_v19 = vsub.f32 1.5, %v341_v36  ;;  %v872_v42 = vadd.f32 1e-06, %v190_v37  ;;  %v881_v51 = vadd.f32 1e-06, %v186_v40 }
 0x106   :  { %v874_v43 = vpop.eup %571  ;;  %v349_v46 = vmul.f32 %v869_v41, %v851_v21  ;;  %v879_v50 = vadd.f32 1e-06, %v196_v20  ;;  %v303_v53 = vmul.f32 %v849_v17, %v302_v18  ;;  %vm355_vm12 = vweird.f32 %v869_v41 }
 0x107   :  { %v574_v52 = vpop.eup %573  ;;  %v343_v54 = vmul.f32 %v855_v22, %v342_v19  ;;  %v229_v24 = vmul.f32 %v874_v43, %v858_v14  ;;  %575 = vrsqrt.f32 %v872_v42  ;;  %vm235_vm14 = vweird.f32 %v874_v43  ;;  %vm962_vm2 = vmor %vm354_vm8, %vm355_vm12 }
 0x108   :  { %v350_v26 = vmul.f32 %v869_v41, %v349_v46  ;;  %v309_v25 = vmul.f32 %v574_v52, %v853_v12  ;;  %577 = vrsqrt.f32 %v879_v50  ;;  %v307_v4 = vsel %vm892_vm5, %v849_v17, %v303_v53  ;;  %vm984_vm5 = vmor %vm234_vm9, %vm235_vm14 }
 0x109   :  { %v230_v60 = vmul.f32 %v874_v43, %v229_v24  ;;  %v347_v5 = vsel %vm899_vm7, %v855_v22, %v343_v54  ;;  %579 = vrsqrt.f32 %v881_v51  ;;  %vm315_vm10 = vweird.f32 %v574_v52 }
 0x10a   :  { %v351_v62 = vmul.f32 0.5, %v350_v26  ;;  %v310_v0 = vmul.f32 %v574_v52, %v309_v25  ;;  %v173_v1 = vpop.xlane.xlu1 %172  ;;  %v155_v3 = vpop.xlane.xlu2 %154  ;;  %v386_v27 = vmul.f32 %v307_v4, %v735_v45  ;;  %v390_v13 = vmul.f32 %v347_v5, %v733_v44  ;;  %vm316_vm13 = vmor %vm314_vm11, %vm315_vm10 }
 0x10b   :  { %v185_v30 = vpop.xlane.xlu0 %184  ;;  %v231_v6 = vmul.f32 0.5, %v230_v60  ;;  %v197_v8 = vmul.f32 %v173_v1, %v729_v38  ;;  %v191_v17 = vmul.f32 %v155_v3, %v729_v38  ;;  %vm264_vm15 = vweird.f32 %v872_v42 }
 0x10c   :  { %v311_v7 = vmul.f32 0.5, %v310_v0  ;;  %v201_v9 = vmul.f32 %v185_v30, %v729_v38  ;;  %v352_v16 = vsub.f32 1.5, %v351_v62  ;;  %vm324_vm1 = vweird.f32 %v879_v50 }
 0x10d   :  { %v913_v10 = vpop.eup %575  ;;  %v923_v28 = vadd.f32 1e-06, %v197_v8  ;;  %v232_v35 = vsub.f32 1.5, %v231_v6  ;;  %v942_v40 = vadd.f32 1e-06, %v191_v17  ;;  %v406_v26 = vmul.f32 %v928_v29, %v386_v27 }
 0x10e   :  { %v312_v23 = vsub.f32 1.5, %v311_v7  ;;  %v259_v22 = vmul.f32 %v913_v10, %v872_v42  ;;  %v930_v31 = vpop.eup %577  ;;  %v933_v39 = vadd.f32 1e-06, %v201_v9  ;;  %v353_v44 = vmul.f32 %v869_v41, %v352_v16 }
 0x10f   :  { %v935_v45 = vpop.eup %579  ;;  %v319_v12 = vmul.f32 %v930_v31, %v879_v50  ;;  %581 = vrsqrt.f32 %v923_v28  ;;  %v967_v25 = vmul.f32 %v874_v43, %v232_v35  ;;  %vm224_vm3 = vweird.f32 %v881_v51 }
 0x110   :  { %v313_v36 = vmul.f32 %v574_v52, %v312_v23  ;;  %v260_v37 = vmul.f32 %v913_v10, %v259_v22  ;;  %v219_v19 = vmul.f32 %v935_v45, %v881_v51  ;;  %583 = vrsqrt.f32 %v933_v39 }
 0x111   :  { %v320_v53 = vmul.f32 %v930_v31, %v319_v12  ;;  %v410_v61 = vmul.f32 %v928_v29, %v390_v13  ;;  %v357_v21 = vsel %vm962_vm2, %v869_v41, %v353_v44  ;;  %585 = vrsqrt.f32 %v942_v40 }
 0x112   :  { %v317_v18 = vsel %vm316_vm13, %v574_v52, %v313_v36  ;;  %v261_v20 = vmul.f32 0.5, %v260_v37  ;;  %v146_v54 = vpop.xlane.xlu1 %145  ;;  %v956_v52 = vld [vmem:[%s1253_s2] ss:$0 sm:$0xff]  ;;  %v220_v56 = vmul.f32 %v935_v45, %v219_v19  ;;  %v182_v60 = vpop.xlane.xlu2 %181  ;;  %vm265_vm4 = vweird.f32 %v913_v10 }
 0x113   :  { %v387_v46 = vmul.f32 %v317_v18, %v751_v58  ;;  %v158_v24 = vpop.xlane.xlu0 %157  ;;  %v321_v0 = vmul.f32 0.5, %v320_v53  ;;  %v188_v3 = vmul.f32 %v146_v54, %v729_v38  ;;  %v200_v30 = vmul.f32 %v182_v60, %v729_v38  ;;  %vm1026_vm9 = vmor %vm264_vm15, %vm265_vm4 }
 0x114   :  { %v262_v62 = vsub.f32 1.5, %v261_v20  ;;  %v221_v1 = vmul.f32 0.5, %v220_v56  ;;  %v192_v4 = vmul.f32 %v158_v24, %v729_v38  ;;  %v426_v7 = vadd.f32 %v956_v52, %v406_v26 }
 0x115   :  { %v322_v41 = vsub.f32 1.5, %v321_v0  ;;  %v407_v6 = vmul.f32 %v928_v29, %v387_v46  ;;  %v391_v8 = vmul.f32 %v357_v21, %v748_v57  ;;  %v237_v9 = vsel %vm984_vm5, %v874_v43, %v967_v25  ;;  %v998_v17 = vpop.eup %581 }
 0x116   :  { %v222_v16 = vsub.f32 1.5, %v221_v1  ;;  %v996_v14 = vadd.f32 1e-06, %v188_v3  ;;  %v1001_v23 = vmul.f32 %v913_v10, %v262_v62  ;;  %vm325_vm6 = vweird.f32 %v930_v31  ;;  %v1007_v57 = vpop.eup %583 }
 0x117   :  { %vm225_vm7 = vweird.f32 %v935_v45  ;;  %v1005_v22 = vadd.f32 1e-06, %v192_v4  ;;  %v329_v13 = vmul.f32 %v998_v17, %v923_v28  ;;  %v1013_v35 = vadd.f32 1e-06, %v200_v30  ;;  %v1015_v36 = vpop.eup %585  ;;  %vm1055_vm14 = vmor %vm324_vm1, %vm325_vm6 }
 0x118   :  { %v223_v27 = vmul.f32 %v935_v45, %v222_v16  ;;  %587 = vrsqrt.f32 %v996_v14  ;;  %v323_v37 = vmul.f32 %v930_v31, %v322_v41  ;;  %vm334_vm8 = vweird.f32 %v923_v28  ;;  %vm1044_vm12 = vmor %vm224_vm3, %vm225_vm7 }
 0x119   :  { %v369_v44 = vmul.f32 %v1007_v57, %v933_v39  ;;  %v427_v12 = vadd.f32 %v956_v52, %v407_v6  ;;  %v330_v20 = vmul.f32 %v998_v17, %v329_v13  ;;  %vm374_vm10 = vweird.f32 %v933_v39 }
 0x11a   :  { %v269_v19 = vmul.f32 %v1015_v36, %v942_v40  ;;  %vm274_vm11 = vweird.f32 %v942_v40  ;;  %v411_v46 = vmul.f32 %v928_v29, %v391_v8  ;;  %v267_v42 = vsel %vm1026_vm9, %v913_v10, %v1001_v23  ;;  %v161_v24 = vpop.xlane.xlu1 %160  ;;  %v149_v56 = vpop.xlane.xlu2 %148 }
 0x11b   :  { %vm335_vm13 = vweird.f32 %v998_v17  ;;  %v370_v54 = vmul.f32 %v1007_v57, %v369_v44  ;;  %589 = vrsqrt.f32 %v1005_v22  ;;  %v227_v51 = vsel %vm1044_vm12, %v935_v45, %v223_v27 }
 0x11c   :  { %v331_v26 = vmul.f32 0.5, %v330_v20  ;;  %v270_v58 = vmul.f32 %v1015_v36, %v269_v19  ;;  %591 = vrsqrt.f32 %v1013_v35  ;;  %v327_v60 = vsel %vm1055_vm14, %v930_v31, %v323_v37  ;;  %vm1085_vm1 = vmor %vm334_vm8, %vm335_vm13 }
 0x11d   :  { %v371_v21 = vmul.f32 0.5, %v370_v54  ;;  %v438_v50 = vpack.c.bf16 %v427_v12, %v426_v7  ;;  %v430_v62 = vadd.f32 %v956_v52, %v410_v61  ;;  %v431_v45 = vadd.f32 %v956_v52, %v411_v46 }
 0x11e   :  { %v1068_v0 = vpop.eup %587  ;;  %v332_v1 = vsub.f32 1.5, %v331_v26  ;;  %v271_v3 = vmul.f32 0.5, %v270_v58  ;;  %v193_v4 = vmul.f32 %v161_v24, %v729_v38  ;;  %v378_v41 = vmul.f32 %v227_v51, %v763_v63 }
 0x11f   :  { %v372_v30 = vsub.f32 1.5, %v371_v21  ;;  %v239_v6 = vmul.f32 %v1068_v0, %v996_v14  ;;  %552 = vmatmul.msk.bf16.vlgmr.msra.gmra.mxu2 %vm34_vm0, %v438_v50  ;;  %v189_v31 = vmul.f32 %v149_v56, %v729_v38  ;;  %vm275_vm15 = vweird.f32 %v1015_v36 }
 0x120   :  { %v333_v61 = vmul.f32 %v998_v17, %v332_v1  ;;  %v272_v7 = vsub.f32 1.5, %v271_v3  ;;  %v440_v8 = vpack.c.bf16 %v431_v45, %v430_v62  ;;  %vm375_vm2 = vweird.f32 %v1007_v57  ;;  %vm276_vm3 = vmor %vm274_vm11, %vm275_vm15 }
 0x121   :  { %v1079_v16 = vpop.eup %589  ;;  %v373_v23 = vmul.f32 %v1007_v57, %v372_v30  ;;  %v240_v38 = vmul.f32 %v1068_v0, %v239_v6  ;;  %v1092_v27 = vadd.f32 1e-06, %v193_v4  ;;  %v1101_v12 = vadd.f32 1e-06, %v189_v31  ;;  %vm1124_vm4 = vmor %vm374_vm10, %vm375_vm2 }
 0x122   :  { %v592_v13 = vpop.eup %591  ;;  %v337_v37 = vsel %vm1085_vm1, %v998_v17, %v333_v61  ;;  %v273_v44 = vmul.f32 %v1015_v36, %v272_v7  ;;  %v279_v28 = vmul.f32 %v1079_v16, %v1005_v22  ;;  %554 = vmatmul.msk.bf16.vlgmr.msra.gmra.mxu3 %vm34_vm0, %v440_v8  ;;  %v379_v18 = vmul.f32 %v237_v9, %v754_v59 }
 0x123   :  { %v382_v20 = vmul.f32 %v267_v42, %v772_v2  ;;  %v359_v17 = vmul.f32 %v592_v13, %v1013_v35  ;;  %v398_v19 = vmul.f32 %v928_v29, %v378_v41  ;;  %v388_v46 = vmul.f32 %v327_v60, %v777_v11 }
 0x124   :  { %v389_v53 = vmul.f32 %v337_v37, %v795_v32  ;;  %v277_v5 = vsel %vm276_vm3, %v1015_v36, %v273_v44  ;;  %v280_v43 = vmul.f32 %v1079_v16, %v279_v28  ;;  %v241_v40 = vmul.f32 0.5, %v240_v38 }
 0x125   :  { %v383_v2 = vmul.f32 %v277_v5, %v780_v15  ;;  %v360_v25 = vmul.f32 %v592_v13, %v359_v17  ;;  %593 = vrsqrt.f32 %v1092_v27  ;;  %v377_v11 = vsel %vm1124_vm4, %v1007_v57, %v373_v23 }
 0x126   :  { %v281_v32 = vmul.f32 0.5, %v280_v43  ;;  %vm284_vm5 = vweird.f32 %v1005_v22  ;;  %595 = vrsqrt.f32 %v1101_v12  ;;  %vm365_vm6 = vweird.f32 %v592_v13 }
 0x127   :  { %v361_v39 = vmul.f32 0.5, %v360_v25  ;;  %v399_v9 = vmul.f32 %v928_v29, %v379_v18  ;;  %v418_v36 = vadd.f32 %v956_v52, %v398_v19  ;;  %v402_v42 = vmul.f32 %v928_v29, %v382_v20 }
 0x128   :  { %v282_v15 = vsub.f32 1.5, %v281_v32  ;;  %v403_v54 = vmul.f32 %v928_v29, %v383_v2  ;;  %v408_v24 = vmul.f32 %v928_v29, %v388_v46  ;;  %v242_v10 = vsub.f32 1.5, %v241_v40 }
 0x129   :  { %v362_v57 = vsub.f32 1.5, %v361_v39  ;;  %v419_v51 = vadd.f32 %v956_v52, %v399_v9  ;;  %v409_v26 = vmul.f32 %v928_v29, %v389_v53  ;;  %v393_v58 = vmul.f32 %v377_v11, %v798_v33 }
 0x12a   :  { %vm364_vm7 = vweird.f32 %v1013_v35  ;;  %v422_v56 = vadd.f32 %v956_v52, %v402_v42  ;;  %v423_v60 = vadd.f32 %v956_v52, %v403_v54  ;;  %vm285_vm8 = vweird.f32 %v1079_v16 }
 0x12b   :  { %v594_v21 = vpop.eup %593  ;;  %v363_v50 = vmul.f32 %v592_v13, %v362_v57  ;;  %v434_v62 = vpack.c.bf16 %v419_v51, %v418_v36  ;;  %v429_v1 = vadd.f32 %v956_v52, %v409_v26  ;;  %v283_v45 = vmul.f32 %v1079_v16, %v282_v15  ;;  %vm366_vm9 = vmor %vm364_vm7, %vm365_vm6 }
 0x12c   :  { %v596_v3 = vpop.eup %595  ;;  %v289_v33 = vmul.f32 %v594_v21, %v1092_v27  ;;  %v436_v4 = vpack.c.bf16 %v423_v60, %v422_v56  ;;  %v428_v35 = vadd.f32 %v956_v52, %v408_v24  ;;  %v243_v41 = vmul.f32 %v1068_v0, %v242_v10  ;;  %vm286_vm12 = vmor %vm284_vm5, %vm285_vm8 }
 0x12d   :  { %vm245_vm10 = vweird.f32 %v1068_v0  ;;  %v367_v30 = vsel %vm366_vm9, %v592_v13, %v363_v50  ;;  %v249_v6 = vmul.f32 %v596_v3, %v1101_v12  ;;  %548 = vmatmul.msk.bf16.vlgmr.msra.gmra.mxu0 %vm34_vm0, %v434_v62  ;;  %v413_v8 = vmul.f32 %v928_v29, %v393_v58 }
 0x12e   :  { %v392_v31 = vmul.f32 %v367_v30, %v801_v34  ;;  %v290_v61 = vmul.f32 %v594_v21, %v289_v33  ;;  %550 = vmatmul.msk.bf16.vlgmr.msra.gmra.mxu1 %vm34_vm0, %v436_v4  ;;  %v439_v7 = vpack.c.bf16 %v429_v1, %v428_v35  ;;  %vm244_vm11 = vweird.f32 %v996_v14 }
 0x12f   :  { %v250_v63 = vmul.f32 %v596_v3, %v249_v6  ;;  %vm246_vm13 = vmor %vm244_vm11, %vm245_vm10  ;;  %v287_v23 = vsel %vm286_vm12, %v1079_v16, %v283_v45  ;;  %vm295_vm14 = vweird.f32 %v594_v21  ;;  %v433_v28 = vadd.f32 %v956_v52, %v413_v8 }
 0x130   :  { %v291_v38 = vmul.f32 0.5, %v290_v61  ;;  %553 = vmatmul.msk.bf16.gmra.mxu2 %vm34_vm0, %v439_v7  ;;  %v412_v34 = vmul.f32 %v928_v29, %v392_v31  ;;  %v247_v13 = vsel %vm246_vm13, %v1068_v0, %v243_v41  ;;  %v384_v22 = vmul.f32 %v287_v23, %v819_v48 }
 0x131   :  { %v251_v37 = vmul.f32 0.5, %v250_v63  ;;  %vm255_vm15 = vweird.f32 %v596_v3  ;;  %v380_v16 = vmul.f32 %v247_v13, %v816_v47  ;;  %vm294_vm1 = vweird.f32 %v1092_v27 }
 0x132   :  { %v292_v44 = vsub.f32 1.5, %v291_v38  ;;  %v432_v14 = vadd.f32 %v956_v52, %v412_v34  ;;  %vm296_vm2 = vmor %vm294_vm1, %vm295_vm14  ;;  %vm254_vm3 = vweird.f32 %v1101_v12  ;;  %v404_v48 = vmul.f32 %v928_v29, %v384_v22 }
 0x133   :  { %v252_v18 = vsub.f32 1.5, %v251_v37  ;;  %vm256_vm4 = vmor %vm254_vm3, %vm255_vm15  ;;  %v400_v47 = vmul.f32 %v928_v29, %v380_v16  ;;  %vm523_vm5 = vcmask 523264  }
 0x134   :  { %v293_v20 = vmul.f32 %v594_v21, %v292_v44  ;;  %v441_v17 = vpack.c.bf16 %v433_v28, %v432_v14  ;;  %v424_v59 = vadd.f32 %v956_v52, %v404_v48 }
 0x135   :  { %v253_v19 = vmul.f32 %v596_v3, %v252_v18  ;;  %v420_v2 = vadd.f32 %v956_v52, %v400_v47 }
 0x136   :  { %v297_v0 = vsel %vm296_vm2, %v594_v21, %v293_v20  ;;  %555 = vmatmul.msk.bf16.gmra.mxu3 %vm34_vm0, %v441_v17 }
 0x137   :  { %v385_v46 = vmul.f32 %v297_v0, %v835_v55  ;;  %v257_v53 = vsel %vm256_vm4, %v596_v3, %v253_v19 }
 0x138   :  { %v381_v5 = vmul.f32 %v257_v53, %v822_v49 }
 0x139   :  { %v405_v27 = vmul.f32 %v928_v29, %v385_v46 }
 0x13a   :  { %v401_v43 = vmul.f32 %v928_v29, %v381_v5 }
 0x13b   :  { %v425_v12 = vadd.f32 %v956_v52, %v405_v27 }
 0x13c   :  { %v421_v40 = vadd.f32 %v956_v52, %v401_v43 }
 0x13d   :  { %v437_v55 = vpack.c.bf16 %v425_v12, %v424_v59 }
 0x13e   :  { %v435_v25 = vpack.c.bf16 %v421_v40, %v420_v2 }
 0x13f   :  { %551 = vmatmul.msk.bf16.gmra.mxu1 %vm34_vm0, %v437_v55 }
 0x140   :  { %549 = vmatmul.msk.bf16.gmra.mxu0 %vm34_vm0, %v435_v25 }
 0x1a2   :  { %v503_v49 = vpop.f32.mrf.mxu2 }
 0x1a3   :  { %532 = vst.msk [vmem:[%s1255_s4 + $0x40] sm:$0xff] %vm523_vm5, %v503_v49 }
 0x1a5   :  { %v513_v29 = vpop.f32.mrf.mxu3 }
 0x1a6   :  { %536 = vst.msk [vmem:[%s1255_s4 + $0x60] sm:$0xff] %vm523_vm5, %v513_v29 }
 0x1aa   :  { %v483_v52 = vpop.f32.mrf.mxu0  ;;  %v505_v11 = vpop.f32.mrf.mxu2 }
 0x1ab   :  { %524 = vst.msk [vmem:[%s1255_s4] sm:$0xff] %vm523_vm5, %v483_v52  ;;  %v493_v32 = vpop.f32.mrf.mxu1 }
 0x1ac   :  { %533 = vst.msk [vmem:[%s1255_s4 + $0x48] sm:$0xff] %vm523_vm5, %v505_v11 }
 0x1ad   :  { %v515_v39 = vpop.f32.mrf.mxu3  ;;  %528 = vst.msk [vmem:[%s1255_s4 + $0x20] sm:$0xff] %vm523_vm5, %v493_v32 }
 0x1ae   :  { %537 = vst.msk [vmem:[%s1255_s4 + $0x68] sm:$0xff] %vm523_vm5, %v515_v39 }
 0x1b2   :  { %v485_v9 = vpop.f32.mrf.mxu0 }
 0x1b3   :  { %525 = vst.msk [vmem:[%s1255_s4 + $0x8] sm:$0xff] %vm523_vm5, %v485_v9  ;;  %v508_v36 = vpop.f32.mrf.mxu2  ;;  %v495_v15 = vpop.f32.mrf.mxu1 }
 0x1b4   :  { %534 = vst.msk [vmem:[%s1255_s4 + $0x50] sm:$0xff] %vm523_vm5, %v508_v36 }
 0x1b5   :  { %529 = vst.msk [vmem:[%s1255_s4 + $0x28] sm:$0xff] %vm523_vm5, %v495_v15 }
 0x1b9   :  { %v518_v42 = vpop.f32.mrf.mxu3 }
 0x1ba   :  { %538 = vst.msk [vmem:[%s1255_s4 + $0x70] sm:$0xff] %vm523_vm5, %v518_v42 }
 0x1bb   :  { %v510_v54 = vpop.f32.mrf.mxu2 }
 0x1bc   :  { %535 = vst.msk [vmem:[%s1255_s4 + $0x58] sm:$0xff] %vm523_vm5, %v510_v54  ;;  %v498_v24 = vpop.f32.mrf.mxu1 }
 0x1bd   :  { %v488_v10 = vpop.f32.mrf.mxu0  ;;  %530 = vst.msk [vmem:[%s1255_s4 + $0x30] sm:$0xff] %vm523_vm5, %v498_v24 }
 0x1be   :  { %526 = vst.msk [vmem:[%s1255_s4 + $0x10] sm:$0xff] %vm523_vm5, %v488_v10 }
 0x1c1   :  { %v520_v57 = vpop.f32.mrf.mxu3 }
 0x1c2   :  { %539 = vst.msk [vmem:[%s1255_s4 + $0x78] sm:$0xff] %vm523_vm5, %v520_v57 }
 0x1c4   :  { %v500_v51 = vpop.f32.mrf.mxu1 }
 0x1c5   :  { %v490_v26 = vpop.f32.mrf.mxu0  ;;  %531 = vst.msk [vmem:[%s1255_s4 + $0x38] sm:$0xff] %vm523_vm5, %v500_v51 }
 0x1c6   :  { %527 = vst.msk [vmem:[%s1255_s4 + $0x18] sm:$0xff] %vm523_vm5, %v490_v26 }

</bundles_post_ra>
